<compile_context>
chip_gen: v7x
topology: tpu7x:2x2x1
jax: 0.10.0
libtpu: 0.0.40
codegen_flags: <defaults>
</compile_context>

<pallas_src>
import numpy as np
import jax
import jax.numpy as jnp
from jax import lax
from jax.experimental import pallas as pl
from jax.experimental.pallas import tpu as pltpu

# ----- configuration (matches VoxelProposalLayer defaults) -----
EMBED = 32                 # embed_dims
HEADS = 8                  # num_heads
LEVELS = 3                 # num_levels
POINTS = 4                 # num_points
CH = EMBED // HEADS        # per-head channels
MLP_HIDDEN = 4 * EMBED     # FFN hidden (mlp_ratio=4)
NCOMB = HEADS * LEVELS * POINTS          # 96 (l,p,h) combos
LN_EPS = 1e-5
TQ = 128                   # query-token tile (raise for production scene sizes)
SQRT_HALF = 0.7071067811865476

# bf16 MXU operands for the value / output-proj / FFN matmuls (accumulation stays f32).
# The coordinate / one-hot / softmax / LayerNorm path is kept in f32 on purpose.
MXU_BF16 = True


def _layernorm(x, g, b):
    mu = jnp.mean(x, axis=-1, keepdims=True)
    xc = x - mu
    var = jnp.mean(xc * xc, axis=-1, keepdims=True)
    return xc * jax.lax.rsqrt(var + LN_EPS) * g + b


# ---------------------------------------------------------------------------
# Pallas kernel 1: tiled linear (value projection), parallel + double-buffered
# ---------------------------------------------------------------------------
def linear_pallas(x, w, b, tile_m=256):
    M, K = x.shape
    N = w.shape[1]
    Mp = ((M + tile_m - 1) // tile_m) * tile_m
    xp = jnp.pad(x, ((0, Mp - M), (0, 0))) if Mp != M else x

    def kernel(x_ref, w_ref, b_ref, o_ref):
        o_ref[...] = (jnp.dot(x_ref[...], w_ref[...],
                              preferred_element_type=jnp.float32) + b_ref[...])

    out = pl.pallas_call(
        kernel,
        out_shape=jax.ShapeDtypeStruct((Mp, N), jnp.float32),
        grid=(Mp // tile_m,),
        in_specs=[pl.BlockSpec((tile_m, K), lambda i: (i, 0)),
                  pl.BlockSpec((K, N), lambda i: (0, 0)),
                  pl.BlockSpec((1, N), lambda i: (0, 0))],
        out_specs=pl.BlockSpec((tile_m, N), lambda i: (i, 0)),
        compiler_params=pltpu.CompilerParams(dimension_semantics=("parallel",)),
    )(xp, w, b)
    return out[:M]


# ---------------------------------------------------------------------------
# Pallas kernel 2: deformable transformer layer over a tile of query tokens
# ---------------------------------------------------------------------------
def _vpl_kernel(q_ref, pos_ref, ref_ref, mask_ref,
                wl_ref, hl_ref, gt_ref, r832_ref,
                e0_ref, e1_ref, e2_ref,
                ioy0_ref, ioy1_ref, ioy2_ref,
                iox0_ref, iox1_ref, iox2_ref,
                bd0_ref, bd1_ref, bd2_ref,
                wqp_ref, bqp_ref, wout_ref, bout_ref,
                g1_ref, be1_ref, w1_ref, b1_ref, w2_ref, b2_ref,
                g2_ref, be2_ref, o_ref):
    f32 = jnp.float32
    mxu_dt = jnp.bfloat16 if MXU_BF16 else f32

    q = q_ref[...]                         # identity (query w/o pos)
    qp = q + pos_ref[...]                  # query + query_pos

    # Fused query-side projection (sampling offsets + attention logits). Kept in f32:
    # it feeds the sampling coordinates (review correctness note).
    proj = jnp.dot(qp, wqp_ref[...], preferred_element_type=f32) + bqp_ref[...]
    ox = proj[:, 0:NCOMB]                  # (TQ, 96), lane col = (l*P + p)*H + h
    oy = proj[:, 128:128 + NCOMB]
    att = proj[:, 256:256 + NCOMB]

    # Lane-dense sampling coordinates for all 96 combos at once:
    #   loc = (ref + off/[W,H]) ;  px = loc_x*W - 0.5  (grid_sample, align_corners=False)
    ref_x = ref_ref[:, 0:1]
    ref_y = ref_ref[:, 1:2]
    px_all = ref_x * wl_ref[...] + ox - 0.5            # (TQ, 96)
    py_all = ref_y * hl_ref[...] + oy - 0.5

    # Lane-dense softmax: exp after a global per-token shift (softmax is shift-invariant),
    # per-head denominators via grouping matmuls; normalization applied after the value
    # contraction (output is linear in the weights).
    m = jnp.max(att, axis=-1, keepdims=True)
    e_all = jnp.exp(att - m)                                           # (TQ, 96)
    den8 = jnp.dot(e_all, gt_ref[...], preferred_element_type=f32)     # (TQ, H)
    den32 = jnp.dot(den8, r832_ref[...], preferred_element_type=f32)   # (TQ, EMBED)

    e_refs = (e0_ref, e1_ref, e2_ref)
    ioy_refs = (ioy0_ref, ioy1_ref, ioy2_ref)
    iox_refs = (iox0_ref, iox1_ref, iox2_ref)
    bd_refs = (bd0_ref, bd1_ref, bd2_ref)

    acc = jnp.zeros((TQ, EMBED), f32)
    for l in range(LEVELS):
        el = e_refs[l][...]        # (H, H*HW_l)  0/1 head-block replication matrix
        ioy = ioy_refs[l][...]     # (1, H*HW_l)  y grid index per lane (hoisted constant)
        iox = iox_refs[l][...]     # (1, H*HW_l)  x grid index per lane
        wsp = jnp.zeros((TQ, el.shape[1]), f32)
        for p in range(POINTS):
            base = (l * POINTS + p) * HEADS
            px8 = px_all[:, base:base + HEADS]          # (TQ, H)
            py8 = py_all[:, base:base + HEADS]
            a8 = e_all[:, base:base + HEADS]            # unnormalized softmax weights
            # head-block expansion on the MXU (replicate each head's scalar over its HW_l lanes)
            pxe = jnp.dot(px8, el, preferred_element_type=f32)
            pye = jnp.dot(py8, el, preferred_element_type=f32)
            ae = jnp.dot(a8, el, preferred_element_type=f32)
            # separable bilinear "tent" weights == grid_sample bilinear with zeros padding
            wy = jnp.maximum(1.0 - jnp.abs(pye - ioy), 0.0)
            wx = jnp.maximum(1.0 - jnp.abs(pxe - iox), 0.0)
            wsp = wsp + ae * wy * wx
        # one value contraction per level for ALL heads (block-diagonal per-head value)
        acc = acc + jnp.dot(wsp.astype(mxu_dt), bd_refs[l][...],
                            preferred_element_type=f32)
    acc = acc / den32                                   # per-head softmax normalization

    # output projection (single full-width matmul) + identity
    attn = (jnp.dot(acc.astype(mxu_dt), wout_ref[...], preferred_element_type=f32)
            + bout_ref[...])
    x = attn + q
    x = _layernorm(x, g1_ref[...], be1_ref[...])        # norm1
    h1 = jnp.dot(x.astype(mxu_dt), w1_ref[...], preferred_element_type=f32) + b1_ref[...]
    h1 = 0.5 * h1 * (1.0 + lax.erf(h1 * SQRT_HALF))     # exact GELU (matches reference)
    h2 = jnp.dot(h1.astype(mxu_dt), w2_ref[...], preferred_element_type=f32) + b2_ref[...]
    x = _layernorm(h2 + x, g2_ref[...], be2_ref[...])   # norm2(ffn + residual)

    # index_fov_back_to_voxels: in-FOV voxels get the attn result, others keep scene_embed
    o_ref[...] = jnp.where(mask_ref[...] > 0.5, x, q)


# ---------------------------------------------------------------------------
# Wrapper (glue in plain JAX / numpy constants)
# ---------------------------------------------------------------------------
def voxel_proposal_layer_forward(params, scene_embed, feats, scene_pos, vol_pts,
                                 ref_pix, scene_shape):
    X, Y, Z = scene_shape
    L = X * Y * Z
    C = scene_embed.shape[-1]
    assert C == EMBED and scene_embed.shape == (1, L, C)
    assert len(feats) == LEVELS
    assert L % TQ == 0
    f32 = jnp.float32
    mxu_dt = jnp.bfloat16 if MXU_BF16 else f32

    # pts_mask from vol_pts (voxel coordinates inside the scene)
    vp = vol_pts[0]
    inb = ((vp[:, 0] >= 0) & (vp[:, 0] < X) &
           (vp[:, 1] >= 0) & (vp[:, 1] < Y) &
           (vp[:, 2] >= 0) & (vp[:, 2] < Z))
    flat = jnp.where(inb, vp[:, 0] * (Y * Z) + vp[:, 1] * Z + vp[:, 2], L)
    pts_mask = jnp.zeros((L + 1,), jnp.bool_).at[flat].set(True)[:L]

    # flatten_multi_scale_feats: NCHW -> NLC, concat levels
    level_hw = tuple((int(f.shape[2]), int(f.shape[3])) for f in feats)
    feat_flatten = jnp.concatenate(
        [jnp.transpose(f.reshape(1, C, -1), (0, 2, 1)) for f in feats], axis=1)[0]

    # value projection (tiled, parallel Pallas matmul)
    v_proj = linear_pallas(feat_flatten.astype(f32), params['w_v'], params['b_v'])

    # per-level block-diagonal per-head value: (H*HW_l, EMBED)
    eye_h = jnp.eye(HEADS, dtype=f32)
    bds, s = [], 0
    for (Hl, Wl) in level_hw:
        HWl = Hl * Wl
        v_l = v_proj[s:s + HWl]
        s += HWl
        vh = jnp.transpose(v_l.reshape(HWl, HEADS, CH), (1, 0, 2))       # (H, HWl, CH)
        bd = (eye_h[:, None, :, None] * vh[:, :, None, :]).reshape(HEADS * HWl, EMBED)
        bds.append(bd.astype(mxu_dt))

    # ---- static constants (numpy, depend only on the module config) ----
    cols = np.arange(NCOMB)
    # new col' = (l*P + p)*H + h  ->  original attention column h*(L*P) + l*P + p
    att_perm = (cols % HEADS) * (LEVELS * POINTS) + (cols // HEADS)
    lev_of_col = (cols // HEADS) // POINTS
    wl_vec = jnp.asarray(np.array([level_hw[l][1] for l in lev_of_col],
                                  np.float32)[None])                     # (1, 96)
    hl_vec = jnp.asarray(np.array([level_hw[l][0] for l in lev_of_col],
                                  np.float32)[None])
    gt = jnp.asarray((cols[:, None] % HEADS ==
                      np.arange(HEADS)[None, :]).astype(np.float32))     # (96, H)
    r832 = jnp.asarray((np.arange(EMBED)[None, :] // CH ==
                        np.arange(HEADS)[:, None]).astype(np.float32))   # (H, EMBED)

    e_mats, ioys, ioxs = [], [], []
    for (Hl, Wl) in level_hw:
        HWl = Hl * Wl
        e_mats.append(jnp.asarray(np.kron(np.eye(HEADS, dtype=np.float32),
                                          np.ones((1, HWl), np.float32))))
        ioys.append(jnp.asarray(np.tile(np.repeat(np.arange(Hl), Wl), HEADS)
                                .astype(np.float32)[None]))
        ioxs.append(jnp.asarray(np.tile(np.tile(np.arange(Wl), Hl), HEADS)
                                .astype(np.float32)[None]))

    # fused + permuted query-side projection weight, segments padded to 128-lane boundaries
    w_off_x = params['w_off'][:, att_perm * 2]
    w_off_y = params['w_off'][:, att_perm * 2 + 1]
    b_off_x = params['b_off'][:, att_perm * 2]
    b_off_y = params['b_off'][:, att_perm * 2 + 1]
    w_att_p = params['w_att'][:, att_perm]
    b_att_p = params['b_att'][:, att_perm]
    w_qp = jnp.zeros((EMBED, 384), f32)
    w_qp = (w_qp.at[:, 0:NCOMB].set(w_off_x)
                .at[:, 128:128 + NCOMB].set(w_off_y)
                .at[:, 256:256 + NCOMB].set(w_att_p))
    b_qp = jnp.zeros((1, 384), f32)
    b_qp = (b_qp.at[:, 0:NCOMB].set(b_off_x)
                .at[:, 128:128 + NCOMB].set(b_off_y)
                .at[:, 256:256 + NCOMB].set(b_att_p))

    # token-tiled inputs
    q2d = scene_embed[0].astype(f32)
    pos2d = (scene_pos[0] if scene_pos is not None else jnp.zeros_like(q2d)).astype(f32)
    ref2d = ref_pix[0].astype(f32)
    mask2d = pts_mask.astype(f32)[:, None]

    w_out = params['w_out'].astype(mxu_dt)
    w1 = params['w1'].astype(mxu_dt)
    w2 = params['w2'].astype(mxu_dt)

    grid = (L // TQ,)
    tok = lambda c: pl.BlockSpec((TQ, c), lambda i: (i, 0))
    rep = lambda a: pl.BlockSpec(a.shape, lambda i: (0, 0))

    rep_inputs = [wl_vec, hl_vec, gt, r832,
                  *e_mats, *ioys, *ioxs, *bds,
                  w_qp, b_qp, w_out, params['b_out'],
                  params['g1'], params['be1'],
                  w1, params['b1'], w2, params['b2'],
                  params['g2'], params['be2']]

    # Note: output block is (TQ, 32) (< 128 lanes -> masked stores). Packing 4 tokens per row
    # for lane-dense stores is possible but secondary to the VALU path here (kept simple).
    out_nlc = pl.pallas_call(
        _vpl_kernel,
        out_shape=jax.ShapeDtypeStruct((L, C), f32),
        grid=grid,
        in_specs=([tok(C), tok(C), tok(2), tok(1)] + [rep(a) for a in rep_inputs]),
        out_specs=tok(C),
        compiler_params=pltpu.CompilerParams(
            dimension_semantics=("parallel",),
            vmem_limit_bytes=32 * 1024 * 1024),
    )(q2d, pos2d, ref2d, mask2d, *rep_inputs)

    # nlc -> (B, C, X, Y, Z)  (== index_fov_back_to_voxels(nlc_to_nchw(scene_embed), ...))
    return out_nlc.T.reshape(1, C, X, Y, Z)


# ---------------------------------------------------------------------------
# Pure-JAX reference (numerical validation of the kernel)
# ---------------------------------------------------------------------------
def reference_forward(params, scene_embed, feats, scene_pos, vol_pts, ref_pix, scene_shape):
    X, Y, Z = scene_shape
    L = X * Y * Z
    C = scene_embed.shape[-1]
    vp = vol_pts[0]
    inb = ((vp[:, 0] >= 0) & (vp[:, 0] < X) &
           (vp[:, 1] >= 0) & (vp[:, 1] < Y) &
           (vp[:, 2] >= 0) & (vp[:, 2] < Z))
    flat = jnp.where(inb, vp[:, 0] * (Y * Z) + vp[:, 1] * Z + vp[:, 2], L)
    pts_mask = jnp.zeros((L + 1,), jnp.bool_).at[flat].set(True)[:L]

    level_hw = [(int(f.shape[2]), int(f.shape[3])) for f in feats]
    feat_flatten = jnp.concatenate(
        [jnp.transpose(f.reshape(1, C, -1), (0, 2, 1)) for f in feats], axis=1)[0]
    v_proj = feat_flatten @ params['w_v'] + params['b_v']
    v_levels, s = [], 0
    for (Hl, Wl) in level_hw:
        v_levels.append(v_proj[s:s + Hl * Wl])
        s += Hl * Wl

    q = scene_embed[0]
    pos = scene_pos[0]
    refp = ref_pix[0]
    qp = q + pos
    off = (qp @ params['w_off'] + params['b_off']).reshape(L, HEADS, LEVELS, POINTS, 2)
    att = (qp @ params['w_att'] + params['b_att']).reshape(L, HEADS, LEVELS * POINTS)
    aw = jax.nn.softmax(att, -1).reshape(L, HEADS, LEVELS, POINTS)

    heads_out = []
    for h in range(HEADS):
        acc = jnp.zeros((L, CH), jnp.float32)
        for l, (Hl, Wl) in enumerate(level_hw):
            v = v_levels[l][:, h * CH:(h + 1) * CH].reshape(Hl, Wl, CH)
            for p in range(POINTS):
                px = (refp[:, 0] + off[:, h, l, p, 0] / Wl) * Wl - 0.5
                py = (refp[:, 1] + off[:, h, l, p, 1] / Hl) * Hl - 0.5
                x0 = jnp.floor(px)
                y0 = jnp.floor(py)
                wx1 = px - x0
                wx0 = 1 - wx1
                wy1 = py - y0
                wy0 = 1 - wy1

                def samp(xi, yi):
                    valid = (xi >= 0) & (xi <= Wl - 1) & (yi >= 0) & (yi <= Hl - 1)
                    xc = jnp.clip(xi, 0, Wl - 1).astype(jnp.int32)
                    yc = jnp.clip(yi, 0, Hl - 1).astype(jnp.int32)
                    return jnp.where(valid[:, None], v[yc, xc], 0.0)

                s_ = (samp(x0, y0) * (wx0 * wy0)[:, None] +
                      samp(x0 + 1, y0) * (wx1 * wy0)[:, None] +
                      samp(x0, y0 + 1) * (wx0 * wy1)[:, None] +
                      samp(x0 + 1, y0 + 1) * (wx1 * wy1)[:, None])
                acc = acc + aw[:, h, l, p][:, None] * s_
        heads_out.append(acc)
    samp_cat = jnp.concatenate(heads_out, -1)
    x = samp_cat @ params['w_out'] + params['b_out'] + q
    x = _layernorm(x, params['g1'], params['be1'])
    h1 = x @ params['w1'] + params['b1']
    h1 = 0.5 * h1 * (1.0 + jax.lax.erf(h1 * SQRT_HALF))
    x2 = h1 @ params['w2'] + params['b2']
    x = _layernorm(x2 + x, params['g2'], params['be2'])
    out_nlc = jnp.where(pts_mask[:, None], x, q)
    return out_nlc.T.reshape(1, C, X, Y, Z)


# ---------------------------------------------------------------------------
# Deterministic synthetic parameters (shapes from the module's __init__)
# ---------------------------------------------------------------------------
def make_params(key):
    def lin(k, fan_in, fan_out, w_scale=0.05, b_scale=0.02):
        kw, kb = jax.random.split(k)
        return (jax.random.normal(kw, (fan_in, fan_out), jnp.float32) * w_scale,
                jax.random.normal(kb, (1, fan_out), jnp.float32) * b_scale)

    keys = jax.random.split(key, 7)
    p = {}
    p['w_v'], p['b_v'] = lin(keys[0], EMBED, EMBED)                              # value_proj
    p['w_off'], p['b_off'] = lin(keys[1], EMBED, HEADS * LEVELS * POINTS * 2,
                                 w_scale=0.05, b_scale=0.3)                       # sampling_offsets
    p['w_att'], p['b_att'] = lin(keys[2], EMBED, HEADS * LEVELS * POINTS)        # attention_weights
    p['w_out'], p['b_out'] = lin(keys[3], EMBED, EMBED)                          # output_proj
    p['w1'], p['b1'] = lin(keys[4], EMBED, MLP_HIDDEN)                           # ffn[0]
    p['w2'], p['b2'] = lin(keys[5], MLP_HIDDEN, EMBED)                           # ffn[2]
    kg = jax.random.split(keys[6], 4)
    p['g1'] = 1.0 + 0.1 * jax.random.normal(kg[0], (1, EMBED), jnp.float32)      # norm1
    p['be1'] = 0.1 * jax.random.normal(kg[1], (1, EMBED), jnp.float32)
    p['g2'] = 1.0 + 0.1 * jax.random.normal(kg[2], (1, EMBED), jnp.float32)      # norm2
    p['be2'] = 0.1 * jax.random.normal(kg[3], (1, EMBED), jnp.float32)
    return p


if __name__ == "__main__":
    key = jax.random.PRNGKey(0)
    scene_shape = (8, 8, 4)
    X, Y, Z = scene_shape
    L = X * Y * Z

    k1, k2, k3, k4, k5, k6 = jax.random.split(key, 6)
    params = make_params(k1)
    scene_embed = jax.random.normal(k2, (1, L, EMBED), jnp.float32)
    scene_pos = 0.1 * jax.random.normal(k3, (1, L, EMBED), jnp.float32)
    feats = [jax.random.normal(jax.random.fold_in(k4, i), (1, EMBED, hw[0], hw[1]), jnp.float32)
             for i, hw in enumerate([(8, 8), (4, 4), (2, 2)])]          # NCHW multi-scale feats
    vol_pts = jax.random.randint(k5, (1, 300, 3), -2, 12, dtype=jnp.int32)
    ref_pix = jax.random.uniform(k6, (1, L, 2), jnp.float32)

    out = voxel_proposal_layer_forward(params, scene_embed, feats, scene_pos,
                                       vol_pts, ref_pix, scene_shape)
    out = jax.block_until_ready(out)
    assert out.shape == (1, EMBED, X, Y, Z)

    ref = jax.block_until_ready(
        reference_forward(params, scene_embed, feats, scene_pos, vol_pts, ref_pix, scene_shape))
    np.testing.assert_allclose(np.asarray(out), np.asarray(ref), rtol=2e-2, atol=2e-2)

    print("KERNEL_OK")
</pallas_src>

<mosaic_0001>
module attributes {stable_mosaic.version = 11 : i64} {
  func.func @kernel(%arg0: i32, %arg1: memref<256x32xf32, #tpu.memory_space<vmem>>, %arg2: memref<32x32xf32, #tpu.memory_space<vmem>>, %arg3: memref<1x32xf32, #tpu.memory_space<vmem>>, %arg4: memref<256x32xf32, #tpu.memory_space<vmem>>) attributes {dimension_semantics = [#tpu.dimension_semantics<parallel>], iteration_bounds = array<i64: 1>, scalar_prefetch = 0 : i64, scratch_operands = 0 : i64, tpu.core_type = #tpu.core_type<tc>, window_params = [{transform_indices = @transform_0, window_bounds = array<i64: 256, 32>}, {pipeline_mode = #tpu.pipeline_mode<synchronous>, transform_indices = @transform_1, window_bounds = array<i64: 32, 32>}, {pipeline_mode = #tpu.pipeline_mode<synchronous>, transform_indices = @transform_2, window_bounds = array<i64: 1, 32>}, {transform_indices = @transform_3, window_bounds = array<i64: 256, 32>}]} {
    %c0 = arith.constant 0 : index
    %c0_0 = arith.constant 0 : index
    %0 = vector.load %arg1[%c0, %c0_0] : memref<256x32xf32, #tpu.memory_space<vmem>>, vector<256x32xf32>
    %c0_1 = arith.constant 0 : index
    %c0_2 = arith.constant 0 : index
    %1 = vector.load %arg2[%c0_1, %c0_2] : memref<32x32xf32, #tpu.memory_space<vmem>>, vector<32x32xf32>
    %cst = arith.constant dense<0.000000e+00> : vector<256x32xf32>
    %2 = tpu.matmul %0, %1, %cst {dimension_numbers = #tpu.dot_dimension_numbers<[1], [0], [0], [1], [0, 0, 1, 1], [], []>} : vector<256x32xf32>, vector<32x32xf32>, vector<256x32xf32> -> vector<256x32xf32>
    %c0_3 = arith.constant 0 : index
    %c0_4 = arith.constant 0 : index
    %3 = vector.load %arg3[%c0_3, %c0_4] : memref<1x32xf32, #tpu.memory_space<vmem>>, vector<1x32xf32>
    %4 = vector.broadcast %3 : vector<1x32xf32> to vector<256x32xf32>
    %5 = arith.addf %2, %4 : vector<256x32xf32>
    %c0_5 = arith.constant 0 : index
    %c0_6 = arith.constant 0 : index
    %6 = vector.load %arg4[%c0_5, %c0_6] : memref<256x32xf32, #tpu.memory_space<vmem>>, vector<256x32xf32>
    tpu.vector_store %arg4[%c0_5, %c0_6], %5 {strides = array<i32>} : memref<256x32xf32, #tpu.memory_space<vmem>>, vector<256x32xf32>,
    return
  }
  func.func @transform_0(%arg0: i32) -> (i32, i32) {
    %c0_i32 = arith.constant 0 : i32
    %c0_i32_0 = arith.constant 0 : i32
    return %arg0, %c0_i32 : i32, i32
  }
  func.func @transform_1(%arg0: i32) -> (i32, i32) {
    %c0_i32 = arith.constant 0 : i32
    %c0_i32_0 = arith.constant 0 : i32
    %c0_i32_1 = arith.constant 0 : i32
    return %c0_i32, %c0_i32_0 : i32, i32
  }
  func.func @transform_2(%arg0: i32) -> (i32, i32) {
    %c0_i32 = arith.constant 0 : i32
    %c0_i32_0 = arith.constant 0 : i32
    %c0_i32_1 = arith.constant 0 : i32
    return %c0_i32, %c0_i32_0 : i32, i32
  }
  func.func @transform_3(%arg0: i32) -> (i32, i32) {
    %c0_i32 = arith.constant 0 : i32
    %c0_i32_0 = arith.constant 0 : i32
    return %arg0, %c0_i32 : i32, i32
  }
}

</mosaic_0001>

<bundles_post_ra>
// kernel: tpu_custom_call.1
= control target key start
LH: loop header
LB: loop body
LE: loop exit
PB: predicated region body
PF: predicated region fallthrough
CT: control target
= control target key end

     0   :  { %vm57_vm0 = vcmask 261120   ;;  %s877_s1 = inlined_call_operand.vmem [shape: f32[32,32], index: 1, kind: input, shape index: {}]   ;;  %s878_s0 = inlined_call_operand.vmem [shape: f32[256,32], index: 0, kind: input, shape index: {}]   ;;  %s879_s2 = inlined_call_operand.vmem [shape: f32[1,32], index: 2, kind: input, shape index: {}]   ;;  %s880_s3 = inlined_call_operand.vmem [shape: f32[256,32], index: 3, kind: output, shape index: {}]  }
   0x1   :  { %v46_v0 = vld [vmem:[%s877_s1] sm:$0xff]  ;;  %v47_v1 = vld [vmem:[%s877_s1 + $0x8] sm:$0xff]  ;;  %v48_v2 = vld [vmem:[%s877_s1 + $0x10] sm:$0xff] }
   0x2   :  { %v540_v3 = vpack.c.bf16 %v47_v1, %v46_v0  ;;  %v49_v4 = vld [vmem:[%s877_s1 + $0x18] sm:$0xff]  ;;  %v14_v5 = vld [vmem:[%s878_s0] sm:$0xff]  ;;  %v15_v8 = vld [vmem:[%s878_s0 + $0x8] sm:$0xff] }
   0x3   :  { %v30_v6 = vld [vmem:[%s878_s0 + $0x80] sm:$0xff]  ;;  %v544_v7 = vpack.c.bf16 %v49_v4, %v48_v2  ;;  %492 = vmatprep.mubr.msk.f32.mxu0 %vm57_vm0, %v14_v5  ;;  %v31_v9 = vld [vmem:[%s878_s0 + $0x88] sm:$0xff]  ;;  %v16_v10 = vld [vmem:[%s878_s0 + $0x10] sm:$0xff] }
   0x4   :  { %516 = vmatprep.mubr.msk.f32.mxu1 %vm57_vm0, %v30_v6  ;;  %541 = vmatprep.subr.bf16.mxu0 %v540_v3  ;;  %v32_v11 = vld [vmem:[%s878_s0 + $0x90] sm:$0xff]  ;;  %v17_v12 = vld [vmem:[%s878_s0 + $0x18] sm:$0xff]  ;;  %v18_v14 = vld [vmem:[%s878_s0 + $0x20] sm:$0xff] }
   0x5   :  { %548 = vmatprep.subr.bf16.mxu1 %v540_v3  ;;  %543 = vmatpush3.bf16.msra.mxu0 %v540_v3  ;;  %v33_v13 = vld [vmem:[%s878_s0 + $0x98] sm:$0xff]  ;;  %v34_v15 = vld [vmem:[%s878_s0 + $0xa0] sm:$0xff]  ;;  %v19_v16 = vld [vmem:[%s878_s0 + $0x28] sm:$0xff] }
   0x6   :  { %550 = vmatpush3.bf16.msra.mxu1 %v540_v3  ;;  %545 = vmatprep.subr.bf16.mxu0 %v544_v7  ;;  %v35_v17 = vld [vmem:[%s878_s0 + $0xa8] sm:$0xff]  ;;  %v20_v18 = vld [vmem:[%s878_s0 + $0x30] sm:$0xff]  ;;  %v21_v20 = vld [vmem:[%s878_s0 + $0x38] sm:$0xff] }
   0x7   :  { %549 = vmatprep.subr.bf16.mxu1 %v544_v7  ;;  %v36_v19 = vld [vmem:[%s878_s0 + $0xb0] sm:$0xff]  ;;  %v37_v21 = vld [vmem:[%s878_s0 + $0xb8] sm:$0xff]  ;;  %v22_v22 = vld [vmem:[%s878_s0 + $0x40] sm:$0xff] }
   0x8   :  { %v38_v23 = vld [vmem:[%s878_s0 + $0xc0] sm:$0xff]  ;;  %v23_v24 = vld [vmem:[%s878_s0 + $0x48] sm:$0xff]  ;;  %v24_v26 = vld [vmem:[%s878_s0 + $0x50] sm:$0xff] }
   0x9   :  { %547 = vmatpush3.bf16.msra.mxu0 %v544_v7  ;;  %v39_v25 = vld [vmem:[%s878_s0 + $0xc8] sm:$0xff]  ;;  %v40_v27 = vld [vmem:[%s878_s0 + $0xd0] sm:$0xff]  ;;  %v25_v28 = vld [vmem:[%s878_s0 + $0x58] sm:$0xff] }
   0xa   :  { %551 = vmatpush3.bf16.msra.mxu1 %v544_v7  ;;  %v41_v29 = vld [vmem:[%s878_s0 + $0xd8] sm:$0xff]  ;;  %v26_v30 = vld [vmem:[%s878_s0 + $0x60] sm:$0xff]  ;;  %v27_v32 = vld [vmem:[%s878_s0 + $0x68] sm:$0xff] }
   0xb   :  { %v42_v31 = vld [vmem:[%s878_s0 + $0xe0] sm:$0xff]  ;;  %v43_v33 = vld [vmem:[%s878_s0 + $0xe8] sm:$0xff]  ;;  %v28_v34 = vld [vmem:[%s878_s0 + $0x70] sm:$0xff] }
   0xc   :  { %493 = vmatmul.mubr.msk.f32.vlgmr.msra.gmra.mrb[0].mxu0 %vm57_vm0, %v15_v8  ;;  %v44_v35 = vld [vmem:[%s878_s0 + $0xf0] sm:$0xff]  ;;  %v29_v36 = vld [vmem:[%s878_s0 + $0x78] sm:$0xff]  ;;  %v715_v38 = vld [vmem:[%s879_s2] ss:$0 sm:$0xff] }
   0xd   :  { %517 = vmatmul.mubr.msk.f32.vlgmr.msra.gmra.mrb[0].mxu1 %vm57_vm0, %v31_v9  ;;  %495 = vmatprep.mubr.msk.f32.mxu0 %vm57_vm0, %v16_v10  ;;  %v45_v37 = vld [vmem:[%s878_s0 + $0xf8] sm:$0xff] }
   0xe   :  { %519 = vmatprep.mubr.msk.f32.mxu1 %vm57_vm0, %v32_v11 }
  0x10   :  { %496 = vmatmul.mubr.msk.f32.gmra.mrb[2].mxu0 %vm57_vm0, %v17_v12 }
  0x11   :  { %520 = vmatmul.mubr.msk.f32.gmra.mrb[2].mxu1 %vm57_vm0, %v33_v13  ;;  %498 = vmatprep.mubr.msk.f32.mxu0 %vm57_vm0, %v18_v14 }
  0x12   :  { %522 = vmatprep.mubr.msk.f32.mxu1 %vm57_vm0, %v34_v15 }
  0x14   :  { %499 = vmatmul.mubr.msk.f32.gmra.mrb[4].mxu0 %vm57_vm0, %v19_v16 }
  0x15   :  { %523 = vmatmul.mubr.msk.f32.gmra.mrb[4].mxu1 %vm57_vm0, %v35_v17  ;;  %501 = vmatprep.mubr.msk.f32.mxu0 %vm57_vm0, %v20_v18 }
  0x16   :  { %525 = vmatprep.mubr.msk.f32.mxu1 %vm57_vm0, %v36_v19 }
  0x18   :  { %502 = vmatmul.mubr.msk.f32.gmra.mrb[6].mxu0 %vm57_vm0, %v21_v20 }
  0x19   :  { %526 = vmatmul.mubr.msk.f32.gmra.mrb[6].mxu1 %vm57_vm0, %v37_v21  ;;  %504 = vmatprep.mubr.msk.f32.mxu0 %vm57_vm0, %v22_v22 }
  0x1a   :  { %528 = vmatprep.mubr.msk.f32.mxu1 %vm57_vm0, %v38_v23 }
  0x1c   :  { %505 = vmatmul.mubr.msk.f32.gmra.mrb[8].mxu0 %vm57_vm0, %v23_v24 }
  0x1d   :  { %529 = vmatmul.mubr.msk.f32.gmra.mrb[8].mxu1 %vm57_vm0, %v39_v25  ;;  %507 = vmatprep.mubr.msk.f32.mxu0 %vm57_vm0, %v24_v26 }
  0x1e   :  { %531 = vmatprep.mubr.msk.f32.mxu1 %vm57_vm0, %v40_v27 }
  0x20   :  { %508 = vmatmul.mubr.msk.f32.gmra.mrb[10].mxu0 %vm57_vm0, %v25_v28 }
  0x21   :  { %532 = vmatmul.mubr.msk.f32.gmra.mrb[10].mxu1 %vm57_vm0, %v41_v29  ;;  %510 = vmatprep.mubr.msk.f32.mxu0 %vm57_vm0, %v26_v30 }
  0x22   :  { %534 = vmatprep.mubr.msk.f32.mxu1 %vm57_vm0, %v42_v31 }
  0x24   :  { %511 = vmatmul.mubr.msk.f32.gmra.mrb[12].mxu0 %vm57_vm0, %v27_v32 }
  0x25   :  { %535 = vmatmul.mubr.msk.f32.gmra.mrb[12].mxu1 %vm57_vm0, %v43_v33  ;;  %513 = vmatprep.mubr.msk.f32.mxu0 %vm57_vm0, %v28_v34 }
  0x26   :  { %537 = vmatprep.mubr.msk.f32.mxu1 %vm57_vm0, %v44_v35 }
  0x28   :  { %514 = vmatmul.mubr.msk.f32.gmra.mrb[14].mxu0 %vm57_vm0, %v29_v36 }
  0x29   :  { %538 = vmatmul.mubr.msk.f32.gmra.mrb[14].mxu1 %vm57_vm0, %v45_v37 }
  0xdf   :  { %v494_v39 = vpop.f32.mrb[0].mxu0 }
  0xe0   :  { %v518_v40 = vpop.f32.mrb[0].mxu1  ;;  %v226_v41 = vadd.f32 %v494_v39, %v715_v38  ;;  %v220_v43 = vpop.f32.mrb[1].mxu0 }
  0xe1   :  { %v306_v42 = vadd.f32 %v518_v40, %v715_v38  ;;  %v300_v44 = vpop.f32.mrb[1].mxu1  ;;  %v221_v45 = vadd.f32 %v715_v38, %v220_v43 }
  0xe2   :  { %v301_v46 = vadd.f32 %v715_v38, %v300_v44  ;;  %380 = vst.msk [vmem:[%s880_s3 + $0x8] sm:$0xff] %vm57_vm0, %v226_v41 }
  0xe3   :  { %396 = vst.msk [vmem:[%s880_s3 + $0x88] sm:$0xff] %vm57_vm0, %v306_v42  ;;  %379 = vst.msk [vmem:[%s880_s3] sm:$0xff] %vm57_vm0, %v221_v45  ;;  %v497_v47 = vpop.f32.mrb[2].mxu0 }
  0xe4   :  { %395 = vst.msk [vmem:[%s880_s3 + $0x80] sm:$0xff] %vm57_vm0, %v301_v46  ;;  %v521_v48 = vpop.f32.mrb[2].mxu1  ;;  %v236_v49 = vadd.f32 %v497_v47, %v715_v38  ;;  %v230_v51 = vpop.f32.mrb[3].mxu0 }
  0xe5   :  { %v316_v50 = vadd.f32 %v521_v48, %v715_v38  ;;  %v310_v52 = vpop.f32.mrb[3].mxu1  ;;  %v231_v53 = vadd.f32 %v715_v38, %v230_v51 }
  0xe6   :  { %v311_v54 = vadd.f32 %v715_v38, %v310_v52  ;;  %382 = vst.msk [vmem:[%s880_s3 + $0x18] sm:$0xff] %vm57_vm0, %v236_v49 }
  0xe7   :  { %398 = vst.msk [vmem:[%s880_s3 + $0x98] sm:$0xff] %vm57_vm0, %v316_v50  ;;  %381 = vst.msk [vmem:[%s880_s3 + $0x10] sm:$0xff] %vm57_vm0, %v231_v53  ;;  %v500_v55 = vpop.f32.mrb[4].mxu0 }
  0xe8   :  { %397 = vst.msk [vmem:[%s880_s3 + $0x90] sm:$0xff] %vm57_vm0, %v311_v54  ;;  %v524_v56 = vpop.f32.mrb[4].mxu1  ;;  %v246_v57 = vadd.f32 %v500_v55, %v715_v38  ;;  %v240_v59 = vpop.f32.mrb[5].mxu0 }
  0xe9   :  { %v326_v58 = vadd.f32 %v524_v56, %v715_v38  ;;  %v320_v60 = vpop.f32.mrb[5].mxu1  ;;  %v241_v61 = vadd.f32 %v715_v38, %v240_v59 }
  0xea   :  { %v321_v62 = vadd.f32 %v715_v38, %v320_v60  ;;  %384 = vst.msk [vmem:[%s880_s3 + $0x28] sm:$0xff] %vm57_vm0, %v246_v57 }
  0xeb   :  { %400 = vst.msk [vmem:[%s880_s3 + $0xa8] sm:$0xff] %vm57_vm0, %v326_v58  ;;  %383 = vst.msk [vmem:[%s880_s3 + $0x20] sm:$0xff] %vm57_vm0, %v241_v61  ;;  %v503_v63 = vpop.f32.mrb[6].mxu0 }
  0xec   :  { %399 = vst.msk [vmem:[%s880_s3 + $0xa0] sm:$0xff] %vm57_vm0, %v321_v62  ;;  %v527_v0 = vpop.f32.mrb[6].mxu1  ;;  %v256_v1 = vadd.f32 %v503_v63, %v715_v38  ;;  %v250_v3 = vpop.f32.mrb[7].mxu0 }
  0xed   :  { %v336_v2 = vadd.f32 %v527_v0, %v715_v38  ;;  %v330_v4 = vpop.f32.mrb[7].mxu1  ;;  %v251_v5 = vadd.f32 %v715_v38, %v250_v3 }
  0xee   :  { %v331_v6 = vadd.f32 %v715_v38, %v330_v4  ;;  %386 = vst.msk [vmem:[%s880_s3 + $0x38] sm:$0xff] %vm57_vm0, %v256_v1 }
  0xef   :  { %402 = vst.msk [vmem:[%s880_s3 + $0xb8] sm:$0xff] %vm57_vm0, %v336_v2  ;;  %385 = vst.msk [vmem:[%s880_s3 + $0x30] sm:$0xff] %vm57_vm0, %v251_v5  ;;  %v506_v7 = vpop.f32.mrb[8].mxu0 }
  0xf0   :  { %401 = vst.msk [vmem:[%s880_s3 + $0xb0] sm:$0xff] %vm57_vm0, %v331_v6  ;;  %v530_v8 = vpop.f32.mrb[8].mxu1  ;;  %v266_v9 = vadd.f32 %v506_v7, %v715_v38  ;;  %v260_v11 = vpop.f32.mrb[9].mxu0 }
  0xf1   :  { %v346_v10 = vadd.f32 %v530_v8, %v715_v38  ;;  %v340_v12 = vpop.f32.mrb[9].mxu1  ;;  %v261_v13 = vadd.f32 %v715_v38, %v260_v11 }
  0xf2   :  { %v341_v14 = vadd.f32 %v715_v38, %v340_v12  ;;  %388 = vst.msk [vmem:[%s880_s3 + $0x48] sm:$0xff] %vm57_vm0, %v266_v9 }
  0xf3   :  { %404 = vst.msk [vmem:[%s880_s3 + $0xc8] sm:$0xff] %vm57_vm0, %v346_v10  ;;  %387 = vst.msk [vmem:[%s880_s3 + $0x40] sm:$0xff] %vm57_vm0, %v261_v13  ;;  %v509_v15 = vpop.f32.mrb[10].mxu0 }
  0xf4   :  { %403 = vst.msk [vmem:[%s880_s3 + $0xc0] sm:$0xff] %vm57_vm0, %v341_v14  ;;  %v533_v16 = vpop.f32.mrb[10].mxu1  ;;  %v276_v17 = vadd.f32 %v509_v15, %v715_v38  ;;  %v270_v19 = vpop.f32.mrb[11].mxu0 }
  0xf5   :  { %v356_v18 = vadd.f32 %v533_v16, %v715_v38  ;;  %v350_v20 = vpop.f32.mrb[11].mxu1  ;;  %v271_v21 = vadd.f32 %v715_v38, %v270_v19 }
  0xf6   :  { %v351_v22 = vadd.f32 %v715_v38, %v350_v20  ;;  %390 = vst.msk [vmem:[%s880_s3 + $0x58] sm:$0xff] %vm57_vm0, %v276_v17 }
  0xf7   :  { %406 = vst.msk [vmem:[%s880_s3 + $0xd8] sm:$0xff] %vm57_vm0, %v356_v18  ;;  %389 = vst.msk [vmem:[%s880_s3 + $0x50] sm:$0xff] %vm57_vm0, %v271_v21  ;;  %v512_v23 = vpop.f32.mrb[12].mxu0 }
  0xf8   :  { %405 = vst.msk [vmem:[%s880_s3 + $0xd0] sm:$0xff] %vm57_vm0, %v351_v22  ;;  %v536_v24 = vpop.f32.mrb[12].mxu1  ;;  %v286_v25 = vadd.f32 %v512_v23, %v715_v38  ;;  %v280_v27 = vpop.f32.mrb[13].mxu0 }
  0xf9   :  { %v366_v26 = vadd.f32 %v536_v24, %v715_v38  ;;  %v360_v28 = vpop.f32.mrb[13].mxu1  ;;  %v281_v29 = vadd.f32 %v715_v38, %v280_v27 }
  0xfa   :  { %v361_v30 = vadd.f32 %v715_v38, %v360_v28  ;;  %392 = vst.msk [vmem:[%s880_s3 + $0x68] sm:$0xff] %vm57_vm0, %v286_v25 }
  0xfb   :  { %408 = vst.msk [vmem:[%s880_s3 + $0xe8] sm:$0xff] %vm57_vm0, %v366_v26  ;;  %391 = vst.msk [vmem:[%s880_s3 + $0x60] sm:$0xff] %vm57_vm0, %v281_v29  ;;  %v515_v31 = vpop.f32.mrb[14].mxu0 }
  0xfc   :  { %407 = vst.msk [vmem:[%s880_s3 + $0xe0] sm:$0xff] %vm57_vm0, %v361_v30  ;;  %v539_v32 = vpop.f32.mrb[14].mxu1  ;;  %v296_v33 = vadd.f32 %v515_v31, %v715_v38  ;;  %v290_v35 = vpop.f32.mrb[15].mxu0 }
  0xfd   :  { %v376_v34 = vadd.f32 %v539_v32, %v715_v38  ;;  %v370_v36 = vpop.f32.mrb[15].mxu1  ;;  %v291_v37 = vadd.f32 %v715_v38, %v290_v35 }
  0xfe   :  { %v371_v39 = vadd.f32 %v715_v38, %v370_v36  ;;  %394 = vst.msk [vmem:[%s880_s3 + $0x78] sm:$0xff] %vm57_vm0, %v296_v33 }
  0xff   :  { %410 = vst.msk [vmem:[%s880_s3 + $0xf8] sm:$0xff] %vm57_vm0, %v376_v34  ;;  %393 = vst.msk [vmem:[%s880_s3 + $0x70] sm:$0xff] %vm57_vm0, %v291_v37 }
 0x100   :  { %409 = vst.msk [vmem:[%s880_s3 + $0xf0] sm:$0xff] %vm57_vm0, %v371_v39 }

</bundles_post_ra>
